<compile_context>
chip_gen: v7x
topology: tpu7x:2x2x1
jax: 0.10.0
libtpu: 0.0.40
codegen_flags: <defaults>
</compile_context>

<pallas_src>
import jax
import jax.numpy as jnp
from jax.experimental import pallas as pl
from jax.experimental.pallas import tpu as pltpu


def _leaky_relu(x, slope=0.2):
    return jnp.where(x > 0, x, slope * x)


def disc_kernel(x_ref,
                w1_ref, b1_ref,
                w2_ref, b2_ref,
                w3_ref, b3_ref,
                w4_ref, b4_ref,
                o_ref):
    """All four Linear(+LeakyReLU) layers fused for one batch tile."""
    # x arrives as f32 (no extra HBM copy in the wrapper); cast on the VPU —
    # the cast hides under the DMA/MXU.
    x = x_ref[...].astype(jnp.bfloat16)                              # [TB, im_dim]

    h = jnp.dot(x, w1_ref[...], preferred_element_type=jnp.float32) + b1_ref[...]
    h = _leaky_relu(h).astype(jnp.bfloat16)

    h = jnp.dot(h, w2_ref[...], preferred_element_type=jnp.float32) + b2_ref[...]
    h = _leaky_relu(h).astype(jnp.bfloat16)

    h = jnp.dot(h, w3_ref[...], preferred_element_type=jnp.float32) + b3_ref[...]
    h = _leaky_relu(h)                                               # f32 for the reduction

    # Layer 4 (hidden -> 1): elementwise multiply (VPU) + lane reduce (XLU);
    # the MXU stays free.  w4_ref is a (1, hidden) f32 row, b4_ref is (1, 1).
    logit = jnp.sum(h * w4_ref[...], axis=-1, keepdims=True) + b4_ref[...]
    # (TB, 1) store: only B floats total; lane-dense relayout not worth it here.
    o_ref[...] = logit.astype(o_ref.dtype)                           # [TB, 1]


def _tpu_generation():
    try:
        kind = jax.devices()[0].device_kind.lower()
    except Exception:
        kind = ""
    if "v7" in kind:
        return "v7x"
    if "v6" in kind:
        return "v6e"
    if "v5e" in kind or "v5 lite" in kind or "v5lite" in kind:
        return "v5e"
    return "other"


def _device_config():
    """Generation-aware tiling / VMEM knobs (see performance review)."""
    gen = _tpu_generation()
    if gen == "v5e":   # 1 TC, 16 MiB scoped VMEM default -> raise it explicitly
        return dict(num_tc=1, max_tile=1024, vmem_limit_bytes=64 * 1024 * 1024)
    if gen == "v6e":   # 1 TC, 128 MiB VMEM -> big tiles, raised scoped limit
        return dict(num_tc=1, max_tile=2048, vmem_limit_bytes=64 * 1024 * 1024)
    if gen == "v7x":   # 2 TCs, 64 MiB VMEM -> default scoped limit is enough
        return dict(num_tc=2, max_tile=2048, vmem_limit_bytes=None)
    return dict(num_tc=1, max_tile=1024, vmem_limit_bytes=None)


def _pick_batch_tile(B, *, max_tile=1024, num_tc=1):
    """Largest multiple-of-8 divisor of B that is <= max_tile.

    On multi-TensorCore chips (v7x), prefer tiles giving >= 2 grid steps per
    core so each core can double-buffer its x DMA — but only when that still
    leaves tiles >= 256 rows; small batches stay a single big tile."""
    divs = [d for d in range(8, min(B, max_tile) + 1, 8) if B % d == 0]
    if not divs:
        return B  # tiny / odd batch: single full tile (block == full dim is allowed)
    if num_tc > 1:
        good = [d for d in divs if B // d >= 2 * num_tc and d >= 256]
        if good:
            divs = good
    return max(divs, key=lambda d: (d % 128 == 0, d))


def _round_up(d, m=128):
    return ((d + m - 1) // m) * m


def _pad_cols(w, b, to):
    d = w.shape[1]
    if d == to:
        return w, b
    return jnp.pad(w, ((0, 0), (0, to - d))), jnp.pad(b, ((0, to - d),))


def _pad_rows(w, to):
    r = w.shape[0]
    if r == to:
        return w
    return jnp.pad(w, ((0, to - r), (0, 0)))


def discriminator_forward(x, params, *, batch_tile=None):
    """x: [B, im_dim] float32. params: dict of (w, b) per layer, w is [in, out]."""
    B, im_dim = x.shape
    (w1, b1), (w2, b2), (w3, b3), (w4, b4) = (
        params["l1"], params["l2"], params["l3"], params["l4"])

    cfg = _device_config()
    if batch_tile is None:
        batch_tile = _pick_batch_tile(B, max_tile=cfg["max_tile"], num_tc=cfg["num_tc"])
    assert B % batch_tile == 0, (B, batch_tile)
    assert batch_tile % 8 == 0 or batch_tile == B, (
        "batch_tile must be a multiple of 8 (f32/bf16 sublane tiling) or == B")

    # Zero-pad hidden widths to full 128-lane vregs.  Exact: padded biases are
    # zero, LeakyReLU(0)=0, and the matching padded weight rows downstream are
    # zero.  No-op for the real MNIST dims (512/256/128 already lane-aligned).
    d1p = _round_up(w1.shape[1])
    d2p = _round_up(w2.shape[1])
    d3p = _round_up(w3.shape[1])
    w1, b1 = _pad_cols(w1, b1, d1p)
    w2 = _pad_rows(w2, d1p)
    w2, b2 = _pad_cols(w2, b2, d2p)
    w3 = _pad_rows(w3, d2p)
    w3, b3 = _pad_cols(w3, b3, d3p)
    w4 = _pad_rows(w4, d3p)

    # bf16 operands for the MXU (weights only — x stays f32 and is cast
    # in-kernel); biases stay f32 and are added after f32 accumulation.
    w1b = w1.astype(jnp.bfloat16)
    w2b = w2.astype(jnp.bfloat16)
    w3b = w3.astype(jnp.bfloat16)
    b1r = b1.reshape(1, d1p).astype(jnp.float32)
    b2r = b2.reshape(1, d2p).astype(jnp.float32)
    b3r = b3.reshape(1, d3p).astype(jnp.float32)
    w4r = w4.reshape(1, d3p).astype(jnp.float32)   # row vector for the VPU reduction
    b4r = b4.reshape(1, 1).astype(jnp.float32)

    # Note: im_dim is kept as a full-K block (block dim == full array dim is
    # allowed); zero-padding x's K host-side would cost an extra HBM pass.

    def run(single_buffer_consts):
        if single_buffer_consts:
            # Constant blocks (index_map always (0,0)) never change across the
            # grid: single-buffer them to halve their VMEM reservation.
            const_spec = lambda shape: pl.BlockSpec(
                shape, lambda i: (0, 0), pipeline_mode=pl.Buffered(1))
        else:
            const_spec = lambda shape: pl.BlockSpec(shape, lambda i: (0, 0))

        cparams = dict(dimension_semantics=("parallel",))
        if cfg["vmem_limit_bytes"] is not None:
            cparams["vmem_limit_bytes"] = cfg["vmem_limit_bytes"]

        return pl.pallas_call(
            disc_kernel,
            out_shape=jax.ShapeDtypeStruct((B, 1), jnp.float32),
            grid_spec=pltpu.PrefetchScalarGridSpec(
                num_scalar_prefetch=0,
                grid=(B // batch_tile,),
                in_specs=[
                    pl.BlockSpec((batch_tile, im_dim), lambda i: (i, 0)),
                    const_spec(w1b.shape), const_spec(b1r.shape),
                    const_spec(w2b.shape), const_spec(b2r.shape),
                    const_spec(w3b.shape), const_spec(b3r.shape),
                    const_spec(w4r.shape), const_spec(b4r.shape),
                ],
                out_specs=pl.BlockSpec((batch_tile, 1), lambda i: (i, 0)),
            ),
            compiler_params=pltpu.CompilerParams(**cparams),
        )(x, w1b, b1r, w2b, b2r, w3b, b3r, w4r, b4r)

    try:
        return run(True)
    except Exception:
        # Fallback if this JAX build rejects pipeline_mode=pl.Buffered(1);
        # identical semantics, default (double-buffered) constant blocks.
        return run(False)


def init_params(key, im_dim, hidden_dim):
    """Deterministic init matching PyTorch nn.Linear default (uniform +-1/sqrt(fan_in)).
    Weights stored as [in, out]."""
    dims = [(im_dim, hidden_dim * 4),
            (hidden_dim * 4, hidden_dim * 2),
            (hidden_dim * 2, hidden_dim),
            (hidden_dim, 1)]
    params = {}
    for idx, (din, dout) in enumerate(dims, start=1):
        key, kw, kb = jax.random.split(key, 3)
        bound = 1.0 / jnp.sqrt(jnp.float32(din))
        w = jax.random.uniform(kw, (din, dout), jnp.float32, -bound, bound)
        b = jax.random.uniform(kb, (dout,), jnp.float32, -bound, bound)
        params[f"l{idx}"] = (w, b)
    return params


def reference_forward(x, params):
    """Pure-JAX reference mirroring the kernel's precision choices
    (bf16 matmul operands, f32 accumulation, f32 bias/activation)."""
    lrelu = lambda t: jnp.where(t > 0, t, 0.2 * t)
    w1, b1 = params["l1"]
    w2, b2 = params["l2"]
    w3, b3 = params["l3"]
    w4, b4 = params["l4"]

    h = jnp.dot(x.astype(jnp.bfloat16), w1.astype(jnp.bfloat16),
                preferred_element_type=jnp.float32) + b1
    h = lrelu(h).astype(jnp.bfloat16)
    h = jnp.dot(h, w2.astype(jnp.bfloat16),
                preferred_element_type=jnp.float32) + b2
    h = lrelu(h).astype(jnp.bfloat16)
    h = jnp.dot(h, w3.astype(jnp.bfloat16),
                preferred_element_type=jnp.float32) + b3
    h = lrelu(h)
    return jnp.sum(h * w4.reshape(1, -1), axis=-1, keepdims=True) + b4.reshape(1, 1)


if __name__ == "__main__":
    # Small shapes consistent with the module: im_dim=64, hidden_dim=32
    # => layers 64 -> 128 -> 64 -> 32 -> 1
    IM_DIM, HIDDEN = 64, 32
    key = jax.random.PRNGKey(0)
    kx1, kx2, kx3, kp = jax.random.split(key, 4)
    params = init_params(kp, IM_DIM, HIDDEN)

    # Case 1: tiny batch (single full tile).
    B1 = 8
    x1 = jax.random.normal(kx1, (B1, IM_DIM), jnp.float32)
    out1 = jax.block_until_ready(discriminator_forward(x1, params))
    ref1 = reference_forward(x1, params)
    assert out1.shape == (B1, 1), out1.shape
    assert jnp.allclose(out1, ref1, atol=1e-2, rtol=1e-2), (
        f"max err {jnp.max(jnp.abs(out1 - ref1))}")

    # Case 2: auto-selected tile.
    B2 = 64
    x2 = jax.random.normal(kx2, (B2, IM_DIM), jnp.float32)
    out2 = jax.block_until_ready(discriminator_forward(x2, params))
    ref2 = reference_forward(x2, params)
    assert out2.shape == (B2, 1), out2.shape
    assert jnp.allclose(out2, ref2, atol=1e-2, rtol=1e-2), (
        f"max err {jnp.max(jnp.abs(out2 - ref2))}")

    # Case 3: forced multi-step grid (exercises the tiled path on every generation).
    B3 = 256
    x3 = jax.random.normal(kx3, (B3, IM_DIM), jnp.float32)
    out3 = jax.block_until_ready(discriminator_forward(x3, params, batch_tile=64))
    ref3 = reference_forward(x3, params)
    assert out3.shape == (B3, 1), out3.shape
    assert jnp.allclose(out3, ref3, atol=1e-2, rtol=1e-2), (
        f"max err {jnp.max(jnp.abs(out3 - ref3))}")

    print("KERNEL_OK")
</pallas_src>

<mosaic_0001>
module attributes {stable_mosaic.version = 11 : i64} {
  func.func @disc_kernel(%arg0: i32, %arg1: memref<8x64xf32, #tpu.memory_space<vmem>>, %arg2: memref<64x128xbf16, #tpu.memory_space<vmem>>, %arg3: memref<1x128xf32, #tpu.memory_space<vmem>>, %arg4: memref<128x128xbf16, #tpu.memory_space<vmem>>, %arg5: memref<1x128xf32, #tpu.memory_space<vmem>>, %arg6: memref<128x128xbf16, #tpu.memory_space<vmem>>, %arg7: memref<1x128xf32, #tpu.memory_space<vmem>>, %arg8: memref<1x128xf32, #tpu.memory_space<vmem>>, %arg9: memref<1x1xf32, #tpu.memory_space<vmem>>, %arg10: memref<8x1xf32, #tpu.memory_space<vmem>>) attributes {dimension_semantics = [#tpu.dimension_semantics<parallel>], iteration_bounds = array<i64: 1>, scalar_prefetch = 0 : i64, scratch_operands = 0 : i64, tpu.core_type = #tpu.core_type<tc>, window_params = [{transform_indices = @transform_0, window_bounds = array<i64: 8, 64>}, {pipeline_mode = #tpu.pipeline_mode<synchronous>, transform_indices = @transform_1, window_bounds = array<i64: 64, 128>}, {pipeline_mode = #tpu.pipeline_mode<synchronous>, transform_indices = @transform_2, window_bounds = array<i64: 1, 128>}, {pipeline_mode = #tpu.pipeline_mode<synchronous>, transform_indices = @transform_3, window_bounds = array<i64: 128, 128>}, {pipeline_mode = #tpu.pipeline_mode<synchronous>, transform_indices = @transform_4, window_bounds = array<i64: 1, 128>}, {pipeline_mode = #tpu.pipeline_mode<synchronous>, transform_indices = @transform_5, window_bounds = array<i64: 128, 128>}, {pipeline_mode = #tpu.pipeline_mode<synchronous>, transform_indices = @transform_6, window_bounds = array<i64: 1, 128>}, {pipeline_mode = #tpu.pipeline_mode<synchronous>, transform_indices = @transform_7, window_bounds = array<i64: 1, 128>}, {pipeline_mode = #tpu.pipeline_mode<synchronous>, transform_indices = @transform_8, window_bounds = array<i64: 1, 1>}, {transform_indices = @transform_9, window_bounds = array<i64: 8, 1>}]} {
    %c0 = arith.constant 0 : index
    %c0_0 = arith.constant 0 : index
    %0 = vector.load %arg1[%c0, %c0_0] : memref<8x64xf32, #tpu.memory_space<vmem>>, vector<8x64xf32>
    %1 = arith.truncf %0 : vector<8x64xf32> to vector<8x64xbf16>
    %c0_1 = arith.constant 0 : index
    %c0_2 = arith.constant 0 : index
    %2 = vector.load %arg2[%c0_1, %c0_2] : memref<64x128xbf16, #tpu.memory_space<vmem>>, vector<64x128xbf16>
    %cst = arith.constant dense<0.000000e+00> : vector<8x128xf32>
    %3 = tpu.matmul %1, %2, %cst {dimension_numbers = #tpu.dot_dimension_numbers<[1], [0], [0], [1], [0, 0, 1, 1], [], []>} : vector<8x64xbf16>, vector<64x128xbf16>, vector<8x128xf32> -> vector<8x128xf32>
    %c0_3 = arith.constant 0 : index
    %c0_4 = arith.constant 0 : index
    %4 = vector.load %arg3[%c0_3, %c0_4] : memref<1x128xf32, #tpu.memory_space<vmem>>, vector<1x128xf32>
    %5 = vector.broadcast %4 : vector<1x128xf32> to vector<8x128xf32>
    %6 = arith.addf %3, %5 : vector<8x128xf32>
    %cst_5 = arith.constant 0.000000e+00 : f32
    %7 = vector.broadcast %cst_5 : f32 to vector<8x128xf32>
    %8 = arith.cmpf ogt, %6, %7 : vector<8x128xf32>
    %cst_6 = arith.constant 2.000000e-01 : f32
    %9 = vector.broadcast %cst_6 : f32 to vector<8x128xf32>
    %10 = arith.mulf %9, %6 : vector<8x128xf32>
    %11 = arith.select %8, %6, %10 : vector<8x128xi1>, vector<8x128xf32>
    %12 = arith.truncf %11 : vector<8x128xf32> to vector<8x128xbf16>
    %c0_7 = arith.constant 0 : index
    %c0_8 = arith.constant 0 : index
    %13 = vector.load %arg4[%c0_7, %c0_8] : memref<128x128xbf16, #tpu.memory_space<vmem>>, vector<128x128xbf16>
    %cst_9 = arith.constant dense<0.000000e+00> : vector<8x128xf32>
    %14 = tpu.matmul %12, %13, %cst_9 {dimension_numbers = #tpu.dot_dimension_numbers<[1], [0], [0], [1], [0, 0, 1, 1], [], []>} : vector<8x128xbf16>, vector<128x128xbf16>, vector<8x128xf32> -> vector<8x128xf32>
    %c0_10 = arith.constant 0 : index
    %c0_11 = arith.constant 0 : index
    %15 = vector.load %arg5[%c0_10, %c0_11] : memref<1x128xf32, #tpu.memory_space<vmem>>, vector<1x128xf32>
    %16 = vector.broadcast %15 : vector<1x128xf32> to vector<8x128xf32>
    %17 = arith.addf %14, %16 : vector<8x128xf32>
    %cst_12 = arith.constant 0.000000e+00 : f32
    %18 = vector.broadcast %cst_12 : f32 to vector<8x128xf32>
    %19 = arith.cmpf ogt, %17, %18 : vector<8x128xf32>
    %cst_13 = arith.constant 2.000000e-01 : f32
    %20 = vector.broadcast %cst_13 : f32 to vector<8x128xf32>
    %21 = arith.mulf %20, %17 : vector<8x128xf32>
    %22 = arith.select %19, %17, %21 : vector<8x128xi1>, vector<8x128xf32>
    %23 = arith.truncf %22 : vector<8x128xf32> to vector<8x128xbf16>
    %c0_14 = arith.constant 0 : index
    %c0_15 = arith.constant 0 : index
    %24 = vector.load %arg6[%c0_14, %c0_15] : memref<128x128xbf16, #tpu.memory_space<vmem>>, vector<128x128xbf16>
    %cst_16 = arith.constant dense<0.000000e+00> : vector<8x128xf32>
    %25 = tpu.matmul %23, %24, %cst_16 {dimension_numbers = #tpu.dot_dimension_numbers<[1], [0], [0], [1], [0, 0, 1, 1], [], []>} : vector<8x128xbf16>, vector<128x128xbf16>, vector<8x128xf32> -> vector<8x128xf32>
    %c0_17 = arith.constant 0 : index
    %c0_18 = arith.constant 0 : index
    %26 = vector.load %arg7[%c0_17, %c0_18] : memref<1x128xf32, #tpu.memory_space<vmem>>, vector<1x128xf32>
    %27 = vector.broadcast %26 : vector<1x128xf32> to vector<8x128xf32>
    %28 = arith.addf %25, %27 : vector<8x128xf32>
    %cst_19 = arith.constant 0.000000e+00 : f32
    %29 = vector.broadcast %cst_19 : f32 to vector<8x128xf32>
    %30 = arith.cmpf ogt, %28, %29 : vector<8x128xf32>
    %cst_20 = arith.constant 2.000000e-01 : f32
    %31 = vector.broadcast %cst_20 : f32 to vector<8x128xf32>
    %32 = arith.mulf %31, %28 : vector<8x128xf32>
    %33 = arith.select %30, %28, %32 : vector<8x128xi1>, vector<8x128xf32>
    %c0_21 = arith.constant 0 : index
    %c0_22 = arith.constant 0 : index
    %34 = vector.load %arg8[%c0_21, %c0_22] : memref<1x128xf32, #tpu.memory_space<vmem>>, vector<1x128xf32>
    %35 = vector.broadcast %34 : vector<1x128xf32> to vector<8x128xf32>
    %36 = arith.mulf %33, %35 : vector<8x128xf32>
    %cst_23 = arith.constant dense<0.000000e+00> : vector<8xf32>
    %37 = vector.multi_reduction <add>, %36, %cst_23 [1] : vector<8x128xf32> to vector<8xf32>
    %38 = vector.shape_cast %37 : vector<8xf32> to vector<8x1xf32>
    %c0_24 = arith.constant 0 : index
    %c0_25 = arith.constant 0 : index
    %39 = vector.load %arg9[%c0_24, %c0_25] : memref<1x1xf32, #tpu.memory_space<vmem>>, vector<1x1xf32>
    %40 = vector.broadcast %39 : vector<1x1xf32> to vector<8x1xf32>
    %41 = arith.addf %38, %40 : vector<8x1xf32>
    %c0_26 = arith.constant 0 : index
    %c0_27 = arith.constant 0 : index
    %42 = vector.load %arg10[%c0_26, %c0_27] : memref<8x1xf32, #tpu.memory_space<vmem>>, vector<8x1xf32>
    tpu.vector_store %arg10[%c0_26, %c0_27], %41 {strides = array<i32>} : memref<8x1xf32, #tpu.memory_space<vmem>>, vector<8x1xf32>,
    return
  }
  func.func @transform_0(%arg0: i32) -> (i32, i32) {
    %c0_i32 = arith.constant 0 : i32
    %c0_i32_0 = arith.constant 0 : i32
    return %arg0, %c0_i32 : i32, i32
  }
  func.func @transform_1(%arg0: i32) -> (i32, i32) {
    %c0_i32 = arith.constant 0 : i32
    %c0_i32_0 = arith.constant 0 : i32
    %c0_i32_1 = arith.constant 0 : i32
    return %c0_i32, %c0_i32_0 : i32, i32
  }
  func.func @transform_2(%arg0: i32) -> (i32, i32) {
    %c0_i32 = arith.constant 0 : i32
    %c0_i32_0 = arith.constant 0 : i32
    %c0_i32_1 = arith.constant 0 : i32
    return %c0_i32, %c0_i32_0 : i32, i32
  }
  func.func @transform_3(%arg0: i32) -> (i32, i32) {
    %c0_i32 = arith.constant 0 : i32
    %c0_i32_0 = arith.constant 0 : i32
    %c0_i32_1 = arith.constant 0 : i32
    return %c0_i32, %c0_i32_0 : i32, i32
  }
  func.func @transform_4(%arg0: i32) -> (i32, i32) {
    %c0_i32 = arith.constant 0 : i32
    %c0_i32_0 = arith.constant 0 : i32
    %c0_i32_1 = arith.constant 0 : i32
    return %c0_i32, %c0_i32_0 : i32, i32
  }
  func.func @transform_5(%arg0: i32) -> (i32, i32) {
    %c0_i32 = arith.constant 0 : i32
    %c0_i32_0 = arith.constant 0 : i32
    %c0_i32_1 = arith.constant 0 : i32
    return %c0_i32, %c0_i32_0 : i32, i32
  }
  func.func @transform_6(%arg0: i32) -> (i32, i32) {
    %c0_i32 = arith.constant 0 : i32
    %c0_i32_0 = arith.constant 0 : i32
    %c0_i32_1 = arith.constant 0 : i32
    return %c0_i32, %c0_i32_0 : i32, i32
  }
  func.func @transform_7(%arg0: i32) -> (i32, i32) {
    %c0_i32 = arith.constant 0 : i32
    %c0_i32_0 = arith.constant 0 : i32
    %c0_i32_1 = arith.constant 0 : i32
    return %c0_i32, %c0_i32_0 : i32, i32
  }
  func.func @transform_8(%arg0: i32) -> (i32, i32) {
    %c0_i32 = arith.constant 0 : i32
    %c0_i32_0 = arith.constant 0 : i32
    %c0_i32_1 = arith.constant 0 : i32
    return %c0_i32, %c0_i32_0 : i32, i32
  }
  func.func @transform_9(%arg0: i32) -> (i32, i32) {
    %c0_i32 = arith.constant 0 : i32
    %c0_i32_0 = arith.constant 0 : i32
    return %arg0, %c0_i32 : i32, i32
  }
}

module attributes {stable_mosaic.version = 11 : i64} {
  func.func @disc_kernel(%arg0: i32, %arg1: memref<8x64xf32, #tpu.memory_space<vmem>>, %arg2: memref<64x128xbf16, #tpu.memory_space<vmem>>, %arg3: memref<1x128xf32, #tpu.memory_space<vmem>>, %arg4: memref<128x128xbf16, #tpu.memory_space<vmem>>, %arg5: memref<1x128xf32, #tpu.memory_space<vmem>>, %arg6: memref<128x128xbf16, #tpu.memory_space<vmem>>, %arg7: memref<1x128xf32, #tpu.memory_space<vmem>>, %arg8: memref<1x128xf32, #tpu.memory_space<vmem>>, %arg9: memref<1x1xf32, #tpu.memory_space<vmem>>, %arg10: memref<8x1xf32, #tpu.memory_space<vmem>>) attributes {dimension_semantics = [#tpu.dimension_semantics<parallel>], iteration_bounds = array<i64: 1>, scalar_prefetch = 0 : i64, scratch_operands = 0 : i64, tpu.core_type = #tpu.core_type<tc>, window_params = [{transform_indices = @transform_0, window_bounds = array<i64: 8, 64>}, {pipeline_mode = #tpu.pipeline_mode<synchronous>, transform_indices = @transform_1, window_bounds = array<i64: 64, 128>}, {pipeline_mode = #tpu.pipeline_mode<synchronous>, transform_indices = @transform_2, window_bounds = array<i64: 1, 128>}, {pipeline_mode = #tpu.pipeline_mode<synchronous>, transform_indices = @transform_3, window_bounds = array<i64: 128, 128>}, {pipeline_mode = #tpu.pipeline_mode<synchronous>, transform_indices = @transform_4, window_bounds = array<i64: 1, 128>}, {pipeline_mode = #tpu.pipeline_mode<synchronous>, transform_indices = @transform_5, window_bounds = array<i64: 128, 128>}, {pipeline_mode = #tpu.pipeline_mode<synchronous>, transform_indices = @transform_6, window_bounds = array<i64: 1, 128>}, {pipeline_mode = #tpu.pipeline_mode<synchronous>, transform_indices = @transform_7, window_bounds = array<i64: 1, 128>}, {pipeline_mode = #tpu.pipeline_mode<synchronous>, transform_indices = @transform_8, window_bounds = array<i64: 1, 1>}, {transform_indices = @transform_9, window_bounds = array<i64: 8, 1>}]} {
    %c0 = arith.constant 0 : index
    %c0_0 = arith.constant 0 : index
    %0 = vector.load %arg1[%c0, %c0_0] : memref<8x64xf32, #tpu.memory_space<vmem>>, vector<8x64xf32>
    %1 = arith.truncf %0 : vector<8x64xf32> to vector<8x64xbf16>
    %c0_1 = arith.constant 0 : index
    %c0_2 = arith.constant 0 : index
    %2 = vector.load %arg2[%c0_1, %c0_2] : memref<64x128xbf16, #tpu.memory_space<vmem>>, vector<64x128xbf16>
    %cst = arith.constant dense<0.000000e+00> : vector<8x128xf32>
    %3 = tpu.matmul %1, %2, %cst {dimension_numbers = #tpu.dot_dimension_numbers<[1], [0], [0], [1], [0, 0, 1, 1], [], []>} : vector<8x64xbf16>, vector<64x128xbf16>, vector<8x128xf32> -> vector<8x128xf32>
    %c0_3 = arith.constant 0 : index
    %c0_4 = arith.constant 0 : index
    %4 = vector.load %arg3[%c0_3, %c0_4] : memref<1x128xf32, #tpu.memory_space<vmem>>, vector<1x128xf32>
    %5 = vector.broadcast %4 : vector<1x128xf32> to vector<8x128xf32>
    %6 = arith.addf %3, %5 : vector<8x128xf32>
    %cst_5 = arith.constant 0.000000e+00 : f32
    %7 = vector.broadcast %cst_5 : f32 to vector<8x128xf32>
    %8 = arith.cmpf ogt, %6, %7 : vector<8x128xf32>
    %cst_6 = arith.constant 2.000000e-01 : f32
    %9 = vector.broadcast %cst_6 : f32 to vector<8x128xf32>
    %10 = arith.mulf %9, %6 : vector<8x128xf32>
    %11 = arith.select %8, %6, %10 : vector<8x128xi1>, vector<8x128xf32>
    %12 = arith.truncf %11 : vector<8x128xf32> to vector<8x128xbf16>
    %c0_7 = arith.constant 0 : index
    %c0_8 = arith.constant 0 : index
    %13 = vector.load %arg4[%c0_7, %c0_8] : memref<128x128xbf16, #tpu.memory_space<vmem>>, vector<128x128xbf16>
    %cst_9 = arith.constant dense<0.000000e+00> : vector<8x128xf32>
    %14 = tpu.matmul %12, %13, %cst_9 {dimension_numbers = #tpu.dot_dimension_numbers<[1], [0], [0], [1], [0, 0, 1, 1], [], []>} : vector<8x128xbf16>, vector<128x128xbf16>, vector<8x128xf32> -> vector<8x128xf32>
    %c0_10 = arith.constant 0 : index
    %c0_11 = arith.constant 0 : index
    %15 = vector.load %arg5[%c0_10, %c0_11] : memref<1x128xf32, #tpu.memory_space<vmem>>, vector<1x128xf32>
    %16 = vector.broadcast %15 : vector<1x128xf32> to vector<8x128xf32>
    %17 = arith.addf %14, %16 : vector<8x128xf32>
    %cst_12 = arith.constant 0.000000e+00 : f32
    %18 = vector.broadcast %cst_12 : f32 to vector<8x128xf32>
    %19 = arith.cmpf ogt, %17, %18 : vector<8x128xf32>
    %cst_13 = arith.constant 2.000000e-01 : f32
    %20 = vector.broadcast %cst_13 : f32 to vector<8x128xf32>
    %21 = arith.mulf %20, %17 : vector<8x128xf32>
    %22 = arith.select %19, %17, %21 : vector<8x128xi1>, vector<8x128xf32>
    %23 = arith.truncf %22 : vector<8x128xf32> to vector<8x128xbf16>
    %c0_14 = arith.constant 0 : index
    %c0_15 = arith.constant 0 : index
    %24 = vector.load %arg6[%c0_14, %c0_15] : memref<128x128xbf16, #tpu.memory_space<vmem>>, vector<128x128xbf16>
    %cst_16 = arith.constant dense<0.000000e+00> : vector<8x128xf32>
    %25 = tpu.matmul %23, %24, %cst_16 {dimension_numbers = #tpu.dot_dimension_numbers<[1], [0], [0], [1], [0, 0, 1, 1], [], []>} : vector<8x128xbf16>, vector<128x128xbf16>, vector<8x128xf32> -> vector<8x128xf32>
    %c0_17 = arith.constant 0 : index
    %c0_18 = arith.constant 0 : index
    %26 = vector.load %arg7[%c0_17, %c0_18] : memref<1x128xf32, #tpu.memory_space<vmem>>, vector<1x128xf32>
    %27 = vector.broadcast %26 : vector<1x128xf32> to vector<8x128xf32>
    %28 = arith.addf %25, %27 : vector<8x128xf32>
    %cst_19 = arith.constant 0.000000e+00 : f32
    %29 = vector.broadcast %cst_19 : f32 to vector<8x128xf32>
    %30 = arith.cmpf ogt, %28, %29 : vector<8x128xf32>
    %cst_20 = arith.constant 2.000000e-01 : f32
    %31 = vector.broadcast %cst_20 : f32 to vector<8x128xf32>
    %32 = arith.mulf %31, %28 : vector<8x128xf32>
    %33 = arith.select %30, %28, %32 : vector<8x128xi1>, vector<8x128xf32>
    %c0_21 = arith.constant 0 : index
    %c0_22 = arith.constant 0 : index
    %34 = vector.load %arg8[%c0_21, %c0_22] : memref<1x128xf32, #tpu.memory_space<vmem>>, vector<1x128xf32>
    %35 = vector.broadcast %34 : vector<1x128xf32> to vector<8x128xf32>
    %36 = arith.mulf %33, %35 : vector<8x128xf32>
    %cst_23 = arith.constant dense<0.000000e+00> : vector<8xf32>
    %37 = vector.multi_reduction <add>, %36, %cst_23 [1] : vector<8x128xf32> to vector<8xf32>
    %38 = vector.shape_cast %37 : vector<8xf32> to vector<8x1xf32>
    %c0_24 = arith.constant 0 : index
    %c0_25 = arith.constant 0 : index
    %39 = vector.load %arg9[%c0_24, %c0_25] : memref<1x1xf32, #tpu.memory_space<vmem>>, vector<1x1xf32>
    %40 = vector.broadcast %39 : vector<1x1xf32> to vector<8x1xf32>
    %41 = arith.addf %38, %40 : vector<8x1xf32>
    %c0_26 = arith.constant 0 : index
    %c0_27 = arith.constant 0 : index
    %42 = vector.load %arg10[%c0_26, %c0_27] : memref<8x1xf32, #tpu.memory_space<vmem>>, vector<8x1xf32>
    tpu.vector_store %arg10[%c0_26, %c0_27], %41 {strides = array<i32>} : memref<8x1xf32, #tpu.memory_space<vmem>>, vector<8x1xf32>,
    return
  }
  func.func @transform_0(%arg0: i32) -> (i32, i32) {
    %c0_i32 = arith.constant 0 : i32
    %c0_i32_0 = arith.constant 0 : i32
    return %arg0, %c0_i32 : i32, i32
  }
  func.func @transform_1(%arg0: i32) -> (i32, i32) {
    %c0_i32 = arith.constant 0 : i32
    %c0_i32_0 = arith.constant 0 : i32
    %c0_i32_1 = arith.constant 0 : i32
    return %c0_i32, %c0_i32_0 : i32, i32
  }
  func.func @transform_2(%arg0: i32) -> (i32, i32) {
    %c0_i32 = arith.constant 0 : i32
    %c0_i32_0 = arith.constant 0 : i32
    %c0_i32_1 = arith.constant 0 : i32
    return %c0_i32, %c0_i32_0 : i32, i32
  }
  func.func @transform_3(%arg0: i32) -> (i32, i32) {
    %c0_i32 = arith.constant 0 : i32
    %c0_i32_0 = arith.constant 0 : i32
    %c0_i32_1 = arith.constant 0 : i32
    return %c0_i32, %c0_i32_0 : i32, i32
  }
  func.func @transform_4(%arg0: i32) -> (i32, i32) {
    %c0_i32 = arith.constant 0 : i32
    %c0_i32_0 = arith.constant 0 : i32
    %c0_i32_1 = arith.constant 0 : i32
    return %c0_i32, %c0_i32_0 : i32, i32
  }
  func.func @transform_5(%arg0: i32) -> (i32, i32) {
    %c0_i32 = arith.constant 0 : i32
    %c0_i32_0 = arith.constant 0 : i32
    %c0_i32_1 = arith.constant 0 : i32
    return %c0_i32, %c0_i32_0 : i32, i32
  }
  func.func @transform_6(%arg0: i32) -> (i32, i32) {
    %c0_i32 = arith.constant 0 : i32
    %c0_i32_0 = arith.constant 0 : i32
    %c0_i32_1 = arith.constant 0 : i32
    return %c0_i32, %c0_i32_0 : i32, i32
  }
  func.func @transform_7(%arg0: i32) -> (i32, i32) {
    %c0_i32 = arith.constant 0 : i32
    %c0_i32_0 = arith.constant 0 : i32
    %c0_i32_1 = arith.constant 0 : i32
    return %c0_i32, %c0_i32_0 : i32, i32
  }
  func.func @transform_8(%arg0: i32) -> (i32, i32) {
    %c0_i32 = arith.constant 0 : i32
    %c0_i32_0 = arith.constant 0 : i32
    %c0_i32_1 = arith.constant 0 : i32
    return %c0_i32, %c0_i32_0 : i32, i32
  }
  func.func @transform_9(%arg0: i32) -> (i32, i32) {
    %c0_i32 = arith.constant 0 : i32
    %c0_i32_0 = arith.constant 0 : i32
    return %arg0, %c0_i32 : i32, i32
  }
}

</mosaic_0001>

<bundles_post_ra>
// kernel: tpu_custom_call.1
= control target key start
LH: loop header
LB: loop body
LE: loop exit
PB: predicated region body
PF: predicated region fallthrough
CT: control target
= control target key end

     0   :  { %s815_s0 = inlined_call_operand.hbm [shape: f32[8,64], index: 0, kind: input, shape index: {}]   ;;  %s816_s1 = inlined_call_operand.hbm [shape: bf16[64,128], index: 1, kind: input, shape index: {}]   ;;  %s817_s2 = inlined_call_operand.vmem [shape: f32[1,128], index: 2, kind: input, shape index: {}]   ;;  %s818_s3 = inlined_call_operand.hbm [shape: bf16[128,128], index: 3, kind: input, shape index: {}]   ;;  %s819_s4 = inlined_call_operand.vmem [shape: f32[1,128], index: 4, kind: input, shape index: {}]   ;;  %s820_s5 = inlined_call_operand.hbm [shape: bf16[128,128], index: 5, kind: input, shape index: {}]   ;;  %s821_s6 = inlined_call_operand.vmem [shape: f32[1,128], index: 6, kind: input, shape index: {}]   ;;  %s822_s7 = inlined_call_operand.vmem [shape: f32[1,128], index: 7, kind: input, shape index: {}]   ;;  %s823_s8 = inlined_call_operand.<no memory space> [shape: f32[1,1], index: 8, kind: input, shape index: {}]   ;;  %s824_s9 = inlined_call_operand.vmem [shape: f32[8,1], index: 9, kind: output, shape index: {}]  }
   0x1   :  { %v14_v0 = vstv %s823_s8 }
   0x2   :  { %15 = vst [vmem:[#allocation2] sm:$0x1] %v14_v0 }
   0x3   :  { %16 = vsyncpa [#allocation4], 0 }
   0x4   :  { %17 = vsyncpa [#allocation6], 0 }
   0x5   :  { %18 = vsyncpa [#allocation9], 0  ;;  %s656_s11 = smov [#allocation5]   ;;  %s562_s15 = scalar_lea.hbm %s816_s1, 512 }
   0x6   :  { %s34_s12 = sshll.u32 %s656_s11, 4  ;;  %p563_p0 = scmp.ne.s32.totalorder %s816_s1, %s562_s15  ;;  %s35_s12 = int_to_ptr.vmem [resolvable:$true] %s34_s12 }
   0x7   :  { %p566_p1 = scmp.lt.u32.totalorder %s562_s15, %s816_s1 }
   0x9   :  { %p568_p2 = pnand %p566_p1, %p563_p0 }
   0xb   :  { %571 = shalt.err (!%p568_p2)
}
   0xc   :  { %s572_s8 = scalar_lea.vmem %s35_s12, 512  ;;  %p577_p4 = scmp.lt.s32.totalorder %s35_s12, %s35_s12 }
   0xd   :  { %p573_p3 = scmp.ne.s32.totalorder %s35_s12, %s572_s8  ;;  %p578_p5 = scmp.lt.s32.totalorder %s572_s8, %s572_s8 }
   0xf   :  { %p579_p6 = por %p578_p5, %p577_p4 }
  0x11   :  { %p580_p7 = pnand %p579_p6, %p573_p3 }
  0x13   :  { %583 = shalt.err (!%p580_p7)
}
  0x14   :  { %s657_s20 = smov 64   ;;  %s658_s21 = smov 4  }
  0x15   :  { %40 = dma.hbm_to_vmem [thread:$0]  %s816_s1, 512, %s35_s12, [#allocation6], %s657_s20, %s657_s20, %s658_s21  }
  0x16   :  { %s659_s24 = smov [#allocation3]   ;;  %s660_s26 = smov [#allocation7]  }
  0x17   :  { %s25_s25 = sshll.u32 %s659_s24, 4  ;;  %s48_s27 = sshll.u32 %s660_s26, 4  ;;  %s26_s25 = int_to_ptr.vmem [resolvable:$true] %s25_s25  ;;  %s49_s27 = int_to_ptr.vmem [resolvable:$true] %s48_s27 }
  0x18   :  { %s584_s30 = scalar_lea.hbm %s815_s0, 128 }
  0x19   :  { %p585_p8 = scmp.ne.s32.totalorder %s815_s0, %s584_s30  ;;  %p588_p9 = scmp.lt.u32.totalorder %s584_s30, %s815_s0 }
  0x1b   :  { %p590_p10 = pnand %p588_p9, %p585_p8 }
  0x1d   :  { %593 = shalt.err (!%p590_p10)
}
  0x1e   :  { %s594_s1 = scalar_lea.vmem %s26_s25, 128  ;;  %p599_p12 = scmp.lt.s32.totalorder %s26_s25, %s26_s25 }
  0x1f   :  { %p595_p11 = scmp.ne.s32.totalorder %s26_s25, %s594_s1  ;;  %p600_p13 = scmp.lt.s32.totalorder %s594_s1, %s594_s1 }
  0x21   :  { %p601_p0 = por %p600_p13, %p599_p12 }
  0x23   :  { %p602_p1 = pnand %p601_p0, %p595_p11 }
  0x25   :  { %605 = shalt.err (!%p602_p1)
}
  0x26   :  { %28 = dma.hbm_to_vmem [thread:$0]  %s815_s0, 128, %s26_s25, [#allocation4]  }
  0x27   :  { %s606_s18 = scalar_lea.hbm %s818_s3, 1024 }
  0x28   :  { %p607_p2 = scmp.ne.s32.totalorder %s818_s3, %s606_s18  ;;  %p610_p3 = scmp.lt.u32.totalorder %s606_s18, %s818_s3 }
  0x2a   :  { %p612_p4 = pnand %p610_p3, %p607_p2 }
  0x2c   :  { %615 = shalt.err (!%p612_p4)
}
  0x2d   :  { %s616_s24 = scalar_lea.vmem %s49_s27, 1024  ;;  %p621_p6 = scmp.lt.s32.totalorder %s49_s27, %s49_s27 }
  0x2e   :  { %p617_p5 = scmp.ne.s32.totalorder %s49_s27, %s616_s24  ;;  %p622_p7 = scmp.lt.s32.totalorder %s616_s24, %s616_s24 }
  0x30   :  { %p623_p8 = por %p622_p7, %p621_p6 }
  0x32   :  { %p624_p9 = pnand %p623_p8, %p617_p5 }
  0x34   :  { %627 = shalt.err (!%p624_p9)
}
  0x35   :  { %54 = dma.hbm_to_vmem [thread:$0]  %s818_s3, 1024, %s49_s27, [#allocation6], %s657_s20, %s657_s20, %s658_s21  }
  0x36   :  { %s661_s26 = smov [#allocation8]   ;;  %s628_s10 = scalar_lea.hbm %s820_s5, 1024 }
  0x37   :  { %s62_s28 = sshll.u32 %s661_s26, 4  ;;  %p629_p10 = scmp.ne.s32.totalorder %s820_s5, %s628_s10  ;;  %s63_s28 = int_to_ptr.vmem [resolvable:$true] %s62_s28 }
  0x38   :  { %p632_p11 = scmp.lt.u32.totalorder %s628_s10, %s820_s5 }
  0x3a   :  { %p634_p12 = pnand %p632_p11, %p629_p10 }
  0x3c   :  { %637 = shalt.err (!%p634_p12)
}
  0x3d   :  { %s638_s12 = scalar_lea.vmem %s63_s28, 1024  ;;  %p643_p0 = scmp.lt.s32.totalorder %s63_s28, %s63_s28 }
  0x3e   :  { %p639_p13 = scmp.ne.s32.totalorder %s63_s28, %s638_s12  ;;  %p644_p1 = scmp.lt.s32.totalorder %s638_s12, %s638_s12 }
  0x40   :  { %p645_p2 = por %p644_p1, %p643_p0 }
  0x42   :  { %p646_p3 = pnand %p645_p2, %p639_p13 }
  0x44   :  { %649 = shalt.err (!%p646_p3)
}
  0x45   :  { %68 = dma.hbm_to_vmem [thread:$0]  %s820_s5, 1024, %s63_s28, [#allocation9], %s657_s20, %s657_s20, %s658_s21  }
  0x46   :  { %650 = dma.done.wait [#allocation4], 128  }
  0x47   :  { %651 = vsyncadd [#allocation4], 4294967168 }
  0x48   :  { %652 = dma.done.wait [#allocation6], 1536  }
  0x49   :  { %653 = vsyncadd [#allocation6], 4294965760 }
  0x4a   :  { %654 = dma.done.wait [#allocation9], 1024  }
  0x4b   :  { %655 = vsyncadd [#allocation9], 4294966272  ;;  %v662_v1 = vmov 0.0   ;;  %vm663_vm0 = vmmov 0   ;;  %v542_v2 = vld [vmem:[#allocation5] sm:$0xff]   ;;  %v543_v3 = vld [vmem:[#allocation5 + $0x8] sm:$0xff]  }
  0x4c   :  { %482 = vmatprep.subr.bf16.mxu0 %v662_v1  ;;  %490 = vmatprep.mubr.msk.bf16.mxu0 %vm663_vm0, %v662_v1  ;;  %v546_v4 = vld [vmem:[#allocation7] sm:$0xff]   ;;  %v544_v5 = vld [vmem:[#allocation5 + $0x10] sm:$0xff]   ;;  %v547_v6 = vld [vmem:[#allocation7 + $0x8] sm:$0xff]   ;;  %vm129_vm1 = vcmask 523264   ;;  %vm424_vm5 = vcmask 7168  }
  0x4d   :  { %494 = vmatprep.subr.bf16.mxu1 %v662_v1  ;;  %510 = vmatprep.mubr.msk.bf16.mxu1 %vm663_vm0, %v662_v1  ;;  %v545_v7 = vld [vmem:[#allocation5 + $0x18] sm:$0xff]   ;;  %v548_v9 = vld [vmem:[#allocation7 + $0x10] sm:$0xff]   ;;  %v550_v12 = vld [vmem:[#allocation7 + $0x20] sm:$0xff]  }
  0x4e   :  { %483 = vmatpush3.bf16.msra.mxu0 %v542_v2  ;;  %495 = vmatpush3.bf16.msra.mxu1 %v546_v4  ;;  %v88_v8 = vld [vmem:[#allocation3] sm:$0xff]  ;;  %v551_v13 = vld [vmem:[#allocation7 + $0x28] sm:$0xff]   ;;  %v552_v14 = vld [vmem:[#allocation7 + $0x30] sm:$0xff]  }
  0x4f   :  { %484 = vmatprep.subr.bf16.mxu0 %v662_v1  ;;  %496 = vmatprep.subr.bf16.mxu1 %v662_v1  ;;  %v89_v10 = vpack.c.bf16 %v88_v8, %v88_v8  ;;  %v549_v11 = vld [vmem:[#allocation7 + $0x18] sm:$0xff]   ;;  %v554_v16 = vld [vmem:[#allocation8] sm:$0xff]   ;;  %v555_v17 = vld [vmem:[#allocation8 + $0x8] sm:$0xff]  }
  0x50   :  { %v553_v15 = vld [vmem:[#allocation7 + $0x38] sm:$0xff]   ;;  %v556_v18 = vld [vmem:[#allocation8 + $0x10] sm:$0xff]   ;;  %v558_v20 = vld [vmem:[#allocation8 + $0x20] sm:$0xff]  }
  0x51   :  { %v557_v19 = vld [vmem:[#allocation8 + $0x18] sm:$0xff]   ;;  %v559_v21 = vld [vmem:[#allocation8 + $0x28] sm:$0xff]   ;;  %v433_v22 = vld [vmem:[%s817_s2] ss:$0 sm:$0xff] }
  0x52   :  { %485 = vmatpush3.bf16.msra.mxu0 %v543_v3  ;;  %497 = vmatpush3.bf16.msra.mxu1 %v547_v6  ;;  %v560_v31 = vld [vmem:[#allocation8 + $0x30] sm:$0xff]   ;;  %v561_v32 = vld [vmem:[#allocation8 + $0x38] sm:$0xff]  }
  0x53   :  { %486 = vmatprep.subr.bf16.mxu0 %v662_v1  ;;  %498 = vmatprep.subr.bf16.mxu1 %v662_v1  ;;  %v439_v33 = vld [vmem:[%s819_s4] ss:$0 sm:$0xff] }
  0x54   :  { %v448_v42 = vld [vmem:[%s821_s6] ss:$0 sm:$0xff] }
  0x55   :  { %v457_v49 = vld [vmem:[%s822_s7] ss:$0 sm:$0xff] }
  0x56   :  { %487 = vmatpush3.bf16.msra.mxu0 %v544_v5  ;;  %499 = vmatpush3.bf16.msra.mxu1 %v548_v9  ;;  %v458_v52 = vld [vmem:[#allocation2] ss:$0 sm:$0xff] }
  0x57   :  { %488 = vmatprep.subr.bf16.mxu0 %v662_v1  ;;  %500 = vmatprep.subr.bf16.mxu1 %v662_v1 }
  0x5a   :  { %489 = vmatpush3.bf16.msra.mxu0 %v545_v7  ;;  %501 = vmatpush3.bf16.msra.mxu1 %v549_v11 }
  0x5b   :  { %514 = vmatprep.subr.bf16.mxu0 %v662_v1  ;;  %502 = vmatprep.subr.bf16.mxu1 %v662_v1 }
  0x5d   :  { %491 = vmatmul.mubr.msk.bf16.vlgmr.msra.gmra.mrb[0].mxu0 %vm129_vm1, %v89_v10 }
  0x5e   :  { %530 = vmatprep.mubr.msk.bf16.mxu0 %vm663_vm0, %v662_v1  ;;  %503 = vmatpush3.bf16.msra.mxu1 %v550_v12 }
  0x5f   :  { %504 = vmatprep.subr.bf16.mxu1 %v662_v1  ;;  %515 = vmatpush3.bf16.msra.mxu0 %v554_v16 }
  0x60   :  { %516 = vmatprep.subr.bf16.mxu0 %v662_v1 }
  0x62   :  { %505 = vmatpush3.bf16.msra.mxu1 %v551_v13 }
  0x63   :  { %506 = vmatprep.subr.bf16.mxu1 %v662_v1  ;;  %517 = vmatpush3.bf16.msra.mxu0 %v555_v17 }
  0x64   :  { %518 = vmatprep.subr.bf16.mxu0 %v662_v1 }
  0x66   :  { %507 = vmatpush3.bf16.msra.mxu1 %v552_v14 }
  0x67   :  { %508 = vmatprep.subr.bf16.mxu1 %v662_v1  ;;  %519 = vmatpush3.bf16.msra.mxu0 %v556_v18 }
  0x68   :  { %520 = vmatprep.subr.bf16.mxu0 %v662_v1 }
  0x6a   :  { %509 = vmatpush3.bf16.msra.mxu1 %v553_v15 }
  0x6b   :  { %521 = vmatpush3.bf16.msra.mxu0 %v557_v19 }
  0x6c   :  { %522 = vmatprep.subr.bf16.mxu0 %v662_v1 }
  0x6f   :  { %523 = vmatpush3.bf16.msra.mxu0 %v558_v20 }
  0x70   :  { %524 = vmatprep.subr.bf16.mxu0 %v662_v1 }
  0x73   :  { %525 = vmatpush3.bf16.msra.mxu0 %v559_v21 }
  0x74   :  { %526 = vmatprep.subr.bf16.mxu0 %v662_v1 }
  0x77   :  { %527 = vmatpush3.bf16.msra.mxu0 %v560_v31 }
  0x78   :  { %528 = vmatprep.subr.bf16.mxu0 %v662_v1 }
  0x7b   :  { %529 = vmatpush3.bf16.msra.mxu0 %v561_v32 }
 0x130   :  { %v167_v23 = vpop.f32.mrb[0].mxu0 }
 0x131   :  { %v168_v24 = vadd.f32 %v433_v22, %v167_v23  ;;  %v492_v25 = vpop.f32.mrb[1].mxu0 }
 0x132   :  { %v170_v26 = vpop.f32.mrb[2].mxu0 }
 0x133   :  { %vm173_vm2 = vcmp.gt.f32.partialorder %v168_v24, 0.0  ;;  %v174_v27 = vmul.f32 0.2, %v168_v24  ;;  %v493_v28 = vpop.f32.mrb[3].mxu0 }
 0x135   :  { %v175_v29 = vsel %vm173_vm2, %v168_v24, %v174_v27 }
 0x136   :  { %v176_v30 = vpack.c.bf16 %v175_v29, %v175_v29 }
 0x138   :  { %511 = vmatmul.mubr.bf16.vlgmr.msra.gmra.mrb[0].mxu1 %v176_v30 }
 0x20b   :  { %v282_v34 = vpop.f32.mrb[0].mxu1 }
 0x20c   :  { %v283_v35 = vadd.f32 %v439_v33, %v282_v34  ;;  %v512_v36 = vpop.f32.mrb[1].mxu1 }
 0x20d   :  { %v285_v37 = vpop.f32.mrb[2].mxu1 }
 0x20e   :  { %vm288_vm3 = vcmp.gt.f32.partialorder %v283_v35, 0.0  ;;  %v289_v38 = vmul.f32 0.2, %v283_v35  ;;  %v513_v39 = vpop.f32.mrb[3].mxu1 }
 0x210   :  { %v290_v40 = vsel %vm288_vm3, %v283_v35, %v289_v38 }
 0x211   :  { %v291_v41 = vpack.c.bf16 %v290_v40, %v290_v40 }
 0x213   :  { %531 = vmatmul.mubr.bf16.vlgmr.msra.gmra.mrb[4].mxu0 %v291_v41 }
 0x2e6   :  { %v397_v43 = vpop.f32.mrb[4].mxu0 }
 0x2e7   :  { %v398_v44 = vadd.f32 %v448_v42, %v397_v43  ;;  %v532_v45 = vpop.f32.mrb[5].mxu0 }
 0x2e8   :  { %v400_v46 = vpop.f32.mrb[6].mxu0 }
 0x2e9   :  { %v404_v47 = vmul.f32 0.2, %v398_v44  ;;  %v533_v48 = vpop.f32.mrb[7].mxu0  ;;  %vm403_vm4 = vcmp.gt.f32.partialorder %v398_v44, 0.0 }
 0x2eb   :  { %v405_v50 = vsel %vm403_vm4, %v398_v44, %v404_v47 }
 0x2ec   :  { %v413_v51 = vmul.f32 %v457_v49, %v405_v50 }
 0x2ee   :  { %414 = vadd.xlane.f32.xlu0 %v413_v51 }
 0x37b   :  { %v415_v53 = vpop.xlane.xlu0 %414 }
 0x37c   :  { %v423_v54 = vadd.f32 %v458_v52, %v415_v53 }
 0x37e   :  { %425 = vst.msk [vmem:[%s824_s9] sm:$0xff] %vm424_vm5, %v423_v54 }
 0x37f   :  { %430 = vsyncpa [#allocation4], 1 }
 0x380   :  { %431 = vsyncpa [#allocation6], 1 }
 0x381   :  { %432 = vsyncpa [#allocation9], 1 }

// kernel: tpu_custom_call.1
= control target key start
LH: loop header
LB: loop body
LE: loop exit
PB: predicated region body
PF: predicated region fallthrough
CT: control target
= control target key end

     0   :  { %s815_s0 = inlined_call_operand.hbm [shape: f32[8,64], index: 0, kind: input, shape index: {}]   ;;  %s816_s1 = inlined_call_operand.hbm [shape: bf16[64,128], index: 1, kind: input, shape index: {}]   ;;  %s817_s2 = inlined_call_operand.vmem [shape: f32[1,128], index: 2, kind: input, shape index: {}]   ;;  %s818_s3 = inlined_call_operand.hbm [shape: bf16[128,128], index: 3, kind: input, shape index: {}]   ;;  %s819_s4 = inlined_call_operand.vmem [shape: f32[1,128], index: 4, kind: input, shape index: {}]   ;;  %s820_s5 = inlined_call_operand.hbm [shape: bf16[128,128], index: 5, kind: input, shape index: {}]   ;;  %s821_s6 = inlined_call_operand.vmem [shape: f32[1,128], index: 6, kind: input, shape index: {}]   ;;  %s822_s7 = inlined_call_operand.vmem [shape: f32[1,128], index: 7, kind: input, shape index: {}]   ;;  %s823_s8 = inlined_call_operand.<no memory space> [shape: f32[1,1], index: 8, kind: input, shape index: {}]   ;;  %s824_s9 = inlined_call_operand.vmem [shape: f32[8,1], index: 9, kind: output, shape index: {}]  }
   0x1   :  { %v14_v0 = vstv %s823_s8 }
   0x2   :  { %15 = vst [vmem:[#allocation2] sm:$0x1] %v14_v0 }
   0x3   :  { %16 = vsyncpa [#allocation4], 0 }
   0x4   :  { %17 = vsyncpa [#allocation6], 0 }
   0x5   :  { %18 = vsyncpa [#allocation9], 0  ;;  %s656_s11 = smov [#allocation5]   ;;  %s562_s15 = scalar_lea.hbm %s816_s1, 512 }
   0x6   :  { %s34_s12 = sshll.u32 %s656_s11, 4  ;;  %p563_p0 = scmp.ne.s32.totalorder %s816_s1, %s562_s15  ;;  %s35_s12 = int_to_ptr.vmem [resolvable:$true] %s34_s12 }
   0x7   :  { %p566_p1 = scmp.lt.u32.totalorder %s562_s15, %s816_s1 }
   0x9   :  { %p568_p2 = pnand %p566_p1, %p563_p0 }
   0xb   :  { %571 = shalt.err (!%p568_p2)
}
   0xc   :  { %s572_s8 = scalar_lea.vmem %s35_s12, 512  ;;  %p577_p4 = scmp.lt.s32.totalorder %s35_s12, %s35_s12 }
   0xd   :  { %p573_p3 = scmp.ne.s32.totalorder %s35_s12, %s572_s8  ;;  %p578_p5 = scmp.lt.s32.totalorder %s572_s8, %s572_s8 }
   0xf   :  { %p579_p6 = por %p578_p5, %p577_p4 }
  0x11   :  { %p580_p7 = pnand %p579_p6, %p573_p3 }
  0x13   :  { %583 = shalt.err (!%p580_p7)
}
  0x14   :  { %s657_s20 = smov 64   ;;  %s658_s21 = smov 4  }
  0x15   :  { %40 = dma.hbm_to_vmem [thread:$0]  %s816_s1, 512, %s35_s12, [#allocation6], %s657_s20, %s657_s20, %s658_s21  }
  0x16   :  { %s659_s24 = smov [#allocation3]   ;;  %s660_s26 = smov [#allocation7]  }
  0x17   :  { %s25_s25 = sshll.u32 %s659_s24, 4  ;;  %s48_s27 = sshll.u32 %s660_s26, 4  ;;  %s26_s25 = int_to_ptr.vmem [resolvable:$true] %s25_s25  ;;  %s49_s27 = int_to_ptr.vmem [resolvable:$true] %s48_s27 }
  0x18   :  { %s584_s30 = scalar_lea.hbm %s815_s0, 128 }
  0x19   :  { %p585_p8 = scmp.ne.s32.totalorder %s815_s0, %s584_s30  ;;  %p588_p9 = scmp.lt.u32.totalorder %s584_s30, %s815_s0 }
  0x1b   :  { %p590_p10 = pnand %p588_p9, %p585_p8 }
  0x1d   :  { %593 = shalt.err (!%p590_p10)
}
  0x1e   :  { %s594_s1 = scalar_lea.vmem %s26_s25, 128  ;;  %p599_p12 = scmp.lt.s32.totalorder %s26_s25, %s26_s25 }
  0x1f   :  { %p595_p11 = scmp.ne.s32.totalorder %s26_s25, %s594_s1  ;;  %p600_p13 = scmp.lt.s32.totalorder %s594_s1, %s594_s1 }
  0x21   :  { %p601_p0 = por %p600_p13, %p599_p12 }
  0x23   :  { %p602_p1 = pnand %p601_p0, %p595_p11 }
  0x25   :  { %605 = shalt.err (!%p602_p1)
}
  0x26   :  { %28 = dma.hbm_to_vmem [thread:$0]  %s815_s0, 128, %s26_s25, [#allocation4]  }
  0x27   :  { %s606_s18 = scalar_lea.hbm %s818_s3, 1024 }
  0x28   :  { %p607_p2 = scmp.ne.s32.totalorder %s818_s3, %s606_s18  ;;  %p610_p3 = scmp.lt.u32.totalorder %s606_s18, %s818_s3 }
  0x2a   :  { %p612_p4 = pnand %p610_p3, %p607_p2 }
  0x2c   :  { %615 = shalt.err (!%p612_p4)
}
  0x2d   :  { %s616_s24 = scalar_lea.vmem %s49_s27, 1024  ;;  %p621_p6 = scmp.lt.s32.totalorder %s49_s27, %s49_s27 }
  0x2e   :  { %p617_p5 = scmp.ne.s32.totalorder %s49_s27, %s616_s24  ;;  %p622_p7 = scmp.lt.s32.totalorder %s616_s24, %s616_s24 }
  0x30   :  { %p623_p8 = por %p622_p7, %p621_p6 }
  0x32   :  { %p624_p9 = pnand %p623_p8, %p617_p5 }
  0x34   :  { %627 = shalt.err (!%p624_p9)
}
  0x35   :  { %54 = dma.hbm_to_vmem [thread:$0]  %s818_s3, 1024, %s49_s27, [#allocation6], %s657_s20, %s657_s20, %s658_s21  }
  0x36   :  { %s661_s26 = smov [#allocation8]   ;;  %s628_s10 = scalar_lea.hbm %s820_s5, 1024 }
  0x37   :  { %s62_s28 = sshll.u32 %s661_s26, 4  ;;  %p629_p10 = scmp.ne.s32.totalorder %s820_s5, %s628_s10  ;;  %s63_s28 = int_to_ptr.vmem [resolvable:$true] %s62_s28 }
  0x38   :  { %p632_p11 = scmp.lt.u32.totalorder %s628_s10, %s820_s5 }
  0x3a   :  { %p634_p12 = pnand %p632_p11, %p629_p10 }
  0x3c   :  { %637 = shalt.err (!%p634_p12)
}
  0x3d   :  { %s638_s12 = scalar_lea.vmem %s63_s28, 1024  ;;  %p643_p0 = scmp.lt.s32.totalorder %s63_s28, %s63_s28 }
  0x3e   :  { %p639_p13 = scmp.ne.s32.totalorder %s63_s28, %s638_s12  ;;  %p644_p1 = scmp.lt.s32.totalorder %s638_s12, %s638_s12 }
  0x40   :  { %p645_p2 = por %p644_p1, %p643_p0 }
  0x42   :  { %p646_p3 = pnand %p645_p2, %p639_p13 }
  0x44   :  { %649 = shalt.err (!%p646_p3)
}
  0x45   :  { %68 = dma.hbm_to_vmem [thread:$0]  %s820_s5, 1024, %s63_s28, [#allocation9], %s657_s20, %s657_s20, %s658_s21  }
  0x46   :  { %650 = dma.done.wait [#allocation4], 128  }
  0x47   :  { %651 = vsyncadd [#allocation4], 4294967168 }
  0x48   :  { %652 = dma.done.wait [#allocation6], 1536  }
  0x49   :  { %653 = vsyncadd [#allocation6], 4294965760 }
  0x4a   :  { %654 = dma.done.wait [#allocation9], 1024  }
  0x4b   :  { %655 = vsyncadd [#allocation9], 4294966272  ;;  %v662_v1 = vmov 0.0   ;;  %vm663_vm0 = vmmov 0   ;;  %v542_v2 = vld [vmem:[#allocation5] sm:$0xff]   ;;  %v543_v3 = vld [vmem:[#allocation5 + $0x8] sm:$0xff]  }
  0x4c   :  { %482 = vmatprep.subr.bf16.mxu0 %v662_v1  ;;  %490 = vmatprep.mubr.msk.bf16.mxu0 %vm663_vm0, %v662_v1  ;;  %v546_v4 = vld [vmem:[#allocation7] sm:$0xff]   ;;  %v544_v5 = vld [vmem:[#allocation5 + $0x10] sm:$0xff]   ;;  %v547_v6 = vld [vmem:[#allocation7 + $0x8] sm:$0xff]   ;;  %vm129_vm1 = vcmask 523264   ;;  %vm424_vm5 = vcmask 7168  }
  0x4d   :  { %494 = vmatprep.subr.bf16.mxu1 %v662_v1  ;;  %510 = vmatprep.mubr.msk.bf16.mxu1 %vm663_vm0, %v662_v1  ;;  %v545_v7 = vld [vmem:[#allocation5 + $0x18] sm:$0xff]   ;;  %v548_v9 = vld [vmem:[#allocation7 + $0x10] sm:$0xff]   ;;  %v550_v12 = vld [vmem:[#allocation7 + $0x20] sm:$0xff]  }
  0x4e   :  { %483 = vmatpush3.bf16.msra.mxu0 %v542_v2  ;;  %495 = vmatpush3.bf16.msra.mxu1 %v546_v4  ;;  %v88_v8 = vld [vmem:[#allocation3] sm:$0xff]  ;;  %v551_v13 = vld [vmem:[#allocation7 + $0x28] sm:$0xff]   ;;  %v552_v14 = vld [vmem:[#allocation7 + $0x30] sm:$0xff]  }
  0x4f   :  { %484 = vmatprep.subr.bf16.mxu0 %v662_v1  ;;  %496 = vmatprep.subr.bf16.mxu1 %v662_v1  ;;  %v89_v10 = vpack.c.bf16 %v88_v8, %v88_v8  ;;  %v549_v11 = vld [vmem:[#allocation7 + $0x18] sm:$0xff]   ;;  %v554_v16 = vld [vmem:[#allocation8] sm:$0xff]   ;;  %v555_v17 = vld [vmem:[#allocation8 + $0x8] sm:$0xff]  }
  0x50   :  { %v553_v15 = vld [vmem:[#allocation7 + $0x38] sm:$0xff]   ;;  %v556_v18 = vld [vmem:[#allocation8 + $0x10] sm:$0xff]   ;;  %v558_v20 = vld [vmem:[#allocation8 + $0x20] sm:$0xff]  }
  0x51   :  { %v557_v19 = vld [vmem:[#allocation8 + $0x18] sm:$0xff]   ;;  %v559_v21 = vld [vmem:[#allocation8 + $0x28] sm:$0xff]   ;;  %v433_v22 = vld [vmem:[%s817_s2] ss:$0 sm:$0xff] }
  0x52   :  { %485 = vmatpush3.bf16.msra.mxu0 %v543_v3  ;;  %497 = vmatpush3.bf16.msra.mxu1 %v547_v6  ;;  %v560_v31 = vld [vmem:[#allocation8 + $0x30] sm:$0xff]   ;;  %v561_v32 = vld [vmem:[#allocation8 + $0x38] sm:$0xff]  }
  0x53   :  { %486 = vmatprep.subr.bf16.mxu0 %v662_v1  ;;  %498 = vmatprep.subr.bf16.mxu1 %v662_v1  ;;  %v439_v33 = vld [vmem:[%s819_s4] ss:$0 sm:$0xff] }
  0x54   :  { %v448_v42 = vld [vmem:[%s821_s6] ss:$0 sm:$0xff] }
  0x55   :  { %v457_v49 = vld [vmem:[%s822_s7] ss:$0 sm:$0xff] }
  0x56   :  { %487 = vmatpush3.bf16.msra.mxu0 %v544_v5  ;;  %499 = vmatpush3.bf16.msra.mxu1 %v548_v9  ;;  %v458_v52 = vld [vmem:[#allocation2] ss:$0 sm:$0xff] }
  0x57   :  { %488 = vmatprep.subr.bf16.mxu0 %v662_v1  ;;  %500 = vmatprep.subr.bf16.mxu1 %v662_v1 }
  0x5a   :  { %489 = vmatpush3.bf16.msra.mxu0 %v545_v7  ;;  %501 = vmatpush3.bf16.msra.mxu1 %v549_v11 }
  0x5b   :  { %514 = vmatprep.subr.bf16.mxu0 %v662_v1  ;;  %502 = vmatprep.subr.bf16.mxu1 %v662_v1 }
  0x5d   :  { %491 = vmatmul.mubr.msk.bf16.vlgmr.msra.gmra.mrb[0].mxu0 %vm129_vm1, %v89_v10 }
  0x5e   :  { %530 = vmatprep.mubr.msk.bf16.mxu0 %vm663_vm0, %v662_v1  ;;  %503 = vmatpush3.bf16.msra.mxu1 %v550_v12 }
  0x5f   :  { %504 = vmatprep.subr.bf16.mxu1 %v662_v1  ;;  %515 = vmatpush3.bf16.msra.mxu0 %v554_v16 }
  0x60   :  { %516 = vmatprep.subr.bf16.mxu0 %v662_v1 }
  0x62   :  { %505 = vmatpush3.bf16.msra.mxu1 %v551_v13 }
  0x63   :  { %506 = vmatprep.subr.bf16.mxu1 %v662_v1  ;;  %517 = vmatpush3.bf16.msra.mxu0 %v555_v17 }
  0x64   :  { %518 = vmatprep.subr.bf16.mxu0 %v662_v1 }
  0x66   :  { %507 = vmatpush3.bf16.msra.mxu1 %v552_v14 }
  0x67   :  { %508 = vmatprep.subr.bf16.mxu1 %v662_v1  ;;  %519 = vmatpush3.bf16.msra.mxu0 %v556_v18 }
  0x68   :  { %520 = vmatprep.subr.bf16.mxu0 %v662_v1 }
  0x6a   :  { %509 = vmatpush3.bf16.msra.mxu1 %v553_v15 }
  0x6b   :  { %521 = vmatpush3.bf16.msra.mxu0 %v557_v19 }
  0x6c   :  { %522 = vmatprep.subr.bf16.mxu0 %v662_v1 }
  0x6f   :  { %523 = vmatpush3.bf16.msra.mxu0 %v558_v20 }
  0x70   :  { %524 = vmatprep.subr.bf16.mxu0 %v662_v1 }
  0x73   :  { %525 = vmatpush3.bf16.msra.mxu0 %v559_v21 }
  0x74   :  { %526 = vmatprep.subr.bf16.mxu0 %v662_v1 }
  0x77   :  { %527 = vmatpush3.bf16.msra.mxu0 %v560_v31 }
  0x78   :  { %528 = vmatprep.subr.bf16.mxu0 %v662_v1 }
  0x7b   :  { %529 = vmatpush3.bf16.msra.mxu0 %v561_v32 }
 0x130   :  { %v167_v23 = vpop.f32.mrb[0].mxu0 }
 0x131   :  { %v168_v24 = vadd.f32 %v433_v22, %v167_v23  ;;  %v492_v25 = vpop.f32.mrb[1].mxu0 }
 0x132   :  { %v170_v26 = vpop.f32.mrb[2].mxu0 }
 0x133   :  { %vm173_vm2 = vcmp.gt.f32.partialorder %v168_v24, 0.0  ;;  %v174_v27 = vmul.f32 0.2, %v168_v24  ;;  %v493_v28 = vpop.f32.mrb[3].mxu0 }
 0x135   :  { %v175_v29 = vsel %vm173_vm2, %v168_v24, %v174_v27 }
 0x136   :  { %v176_v30 = vpack.c.bf16 %v175_v29, %v175_v29 }
 0x138   :  { %511 = vmatmul.mubr.bf16.vlgmr.msra.gmra.mrb[0].mxu1 %v176_v30 }
 0x20b   :  { %v282_v34 = vpop.f32.mrb[0].mxu1 }
 0x20c   :  { %v283_v35 = vadd.f32 %v439_v33, %v282_v34  ;;  %v512_v36 = vpop.f32.mrb[1].mxu1 }
 0x20d   :  { %v285_v37 = vpop.f32.mrb[2].mxu1 }
 0x20e   :  { %vm288_vm3 = vcmp.gt.f32.partialorder %v283_v35, 0.0  ;;  %v289_v38 = vmul.f32 0.2, %v283_v35  ;;  %v513_v39 = vpop.f32.mrb[3].mxu1 }
 0x210   :  { %v290_v40 = vsel %vm288_vm3, %v283_v35, %v289_v38 }
 0x211   :  { %v291_v41 = vpack.c.bf16 %v290_v40, %v290_v40 }
 0x213   :  { %531 = vmatmul.mubr.bf16.vlgmr.msra.gmra.mrb[4].mxu0 %v291_v41 }
 0x2e6   :  { %v397_v43 = vpop.f32.mrb[4].mxu0 }
 0x2e7   :  { %v398_v44 = vadd.f32 %v448_v42, %v397_v43  ;;  %v532_v45 = vpop.f32.mrb[5].mxu0 }
 0x2e8   :  { %v400_v46 = vpop.f32.mrb[6].mxu0 }
 0x2e9   :  { %v404_v47 = vmul.f32 0.2, %v398_v44  ;;  %v533_v48 = vpop.f32.mrb[7].mxu0  ;;  %vm403_vm4 = vcmp.gt.f32.partialorder %v398_v44, 0.0 }
 0x2eb   :  { %v405_v50 = vsel %vm403_vm4, %v398_v44, %v404_v47 }
 0x2ec   :  { %v413_v51 = vmul.f32 %v457_v49, %v405_v50 }
 0x2ee   :  { %414 = vadd.xlane.f32.xlu0 %v413_v51 }
 0x37b   :  { %v415_v53 = vpop.xlane.xlu0 %414 }
 0x37c   :  { %v423_v54 = vadd.f32 %v458_v52, %v415_v53 }
 0x37e   :  { %425 = vst.msk [vmem:[%s824_s9] sm:$0xff] %vm424_vm5, %v423_v54 }
 0x37f   :  { %430 = vsyncpa [#allocation4], 1 }
 0x380   :  { %431 = vsyncpa [#allocation6], 1 }
 0x381   :  { %432 = vsyncpa [#allocation9], 1 }

</bundles_post_ra>
